<compile_context>
chip_gen: v7x
topology: tpu7x:2x2x1
jax: 0.10.0
libtpu: 0.0.40
codegen_flags: <defaults>
</compile_context>

<pallas_src>
import functools

import jax
import jax.numpy as jnp
from jax.experimental import pallas as pl
from jax.experimental.pallas import tpu as pltpu

TN = 128          # lanes per tile (vreg lane width)
TM_CAP = 2048     # max sublane rows per grid step (sweepable 512-4096).
                  # At 2048: 2 inputs x 2 pipeline buffers x 1 MiB = 4 MiB VMEM.
NEG_FILL = -1e30  # sigmoid(NEG_FILL) == 0 -> padded logits contribute nothing


def dice_kernel(x_ref, t_ref, o_ref, acc_ref, *, tm, smooth):
    """Accumulates lane-resident partial sums; finalizes dice on last step."""
    i = pl.program_id(0)

    # Zero the (3, 8, 128) vector accumulator on the first grid step.
    @pl.when(i == 0)
    def _():
        acc_ref[...] = jnp.zeros_like(acc_ref)

    x = jax.nn.sigmoid(x_ref[...].astype(jnp.float32))
    t = t_ref[...].astype(jnp.float32)

    # (tm, 128) -> (tm//8, 8, 128): groups of 8 sublane rows map 1:1 onto
    # vregs, so this reshape is free and the axis-0 sums are pure VPU vreg
    # adds -- no cross-lane XLU work and no SMEM scalar round-trip per step.
    xr = x.reshape(tm // 8, 8, TN)
    tr = t.reshape(tm // 8, 8, TN)
    acc_ref[0] += jnp.sum(xr * tr, axis=0)   # intersection partials
    acc_ref[1] += jnp.sum(xr, axis=0)        # sum(sigmoid(inputs)) partials
    acc_ref[2] += jnp.sum(tr, axis=0)        # sum(targets) partials

    # Single XLU reduce + dice formula, once, on the last grid step.
    @pl.when(i == pl.num_programs(0) - 1)
    def _():
        inter = jnp.sum(acc_ref[0])
        sx = jnp.sum(acc_ref[1])
        st = jnp.sum(acc_ref[2])
        dice = (2.0 * inter + smooth) / (sx + st + smooth)
        o_ref[0, 0] = 1.0 - dice


def dice_loss(inputs, targets, smooth=1.0):
    """JAX/Pallas equivalent of DiceLoss.forward(inputs, targets, smooth)."""
    n = inputs.size
    x = inputs.reshape(-1)
    t = targets.reshape(-1)

    # Pick TM: as large as TM_CAP, but no larger than the (8-row-rounded)
    # problem so tiny inputs are not padded up to a huge tile.
    rows_raw = pl.cdiv(n, TN)
    tm = min(TM_CAP, pl.cdiv(rows_raw, 8) * 8)
    num_tiles = pl.cdiv(rows_raw, tm)
    rows = num_tiles * tm
    n_pad = rows * TN

    pad = n_pad - n
    if pad > 0:
        # Pad logits with a large negative value (sigmoid -> 0) and targets
        # with 0 so padded elements contribute nothing; kernel stays mask-free.
        x = jnp.pad(x, (0, pad), constant_values=NEG_FILL)
        t = jnp.pad(t.astype(jnp.float32), (0, pad), constant_values=0.0)

    x2 = x.reshape(rows, TN)
    t2 = t.reshape(rows, TN)

    kern = functools.partial(dice_kernel, tm=tm, smooth=float(smooth))

    # TODO(synk): on v7x, a 2-way "parallel" split over the rows (one partial
    # accumulator per TensorCore, combined in the wrapper) could give ~2x.
    out = pl.pallas_call(
        kern,
        out_shape=jax.ShapeDtypeStruct((1, 1), jnp.float32),
        grid_spec=pltpu.PrefetchScalarGridSpec(
            num_scalar_prefetch=0,
            grid=(num_tiles,),
            in_specs=[
                pl.BlockSpec((tm, TN), lambda i: (i, 0)),
                pl.BlockSpec((tm, TN), lambda i: (i, 0)),
            ],
            # Scalar output, resident across the (sequential) grid.
            out_specs=pl.BlockSpec((1, 1), lambda i: (0, 0),
                                   memory_space=pltpu.MemorySpace.SMEM),
            # Lane-resident vector accumulators: [x*t, x, t] partial sums.
            scratch_shapes=[pltpu.VMEM((3, 8, TN), jnp.float32)],
        ),
        compiler_params=pltpu.CompilerParams(
            dimension_semantics=("arbitrary",)),
    )(x2, t2)
    return out[0, 0]


def dice_loss_ref(inputs, targets, smooth=1.0):
    """Pure-JAX reference mirroring the PyTorch forward."""
    x = jax.nn.sigmoid(inputs.astype(jnp.float32)).reshape(-1)
    t = targets.astype(jnp.float32).reshape(-1)
    inter = jnp.sum(x * t)
    dice = (2.0 * inter + smooth) / (jnp.sum(x) + jnp.sum(t) + smooth)
    return 1.0 - dice


if __name__ == "__main__":
    key = jax.random.PRNGKey(0)
    k1, k2, k3, k4 = jax.random.split(key, 4)

    # NCHW-style logits and binary targets, as DiceLoss would see from a conv net.
    inputs = jax.random.normal(k1, (2, 4, 16, 16), dtype=jnp.float32)
    targets = (jax.random.uniform(k2, (2, 4, 16, 16)) > 0.5).astype(jnp.float32)

    loss = dice_loss(inputs, targets, smooth=1.0)
    jax.block_until_ready(loss)
    ref = dice_loss_ref(inputs, targets, smooth=1.0)
    assert jnp.allclose(loss, ref, atol=1e-5, rtol=1e-5), (loss, ref)

    # Ragged shape exercising the padding path (pad > 0).
    inputs2 = jax.random.normal(k3, (2, 3, 15, 17), dtype=jnp.float32)
    targets2 = (jax.random.uniform(k4, (2, 3, 15, 17)) > 0.5).astype(jnp.float32)

    loss2 = dice_loss(inputs2, targets2, smooth=1.0)
    jax.block_until_ready(loss2)
    ref2 = dice_loss_ref(inputs2, targets2, smooth=1.0)
    assert jnp.allclose(loss2, ref2, atol=1e-5, rtol=1e-5), (loss2, ref2)

    print("KERNEL_OK")
</pallas_src>

<mosaic_0001>
module attributes {stable_mosaic.version = 11 : i64} {
  func.func @dice_kernel(%arg0: i32, %arg1: memref<16x128xf32, #tpu.memory_space<vmem>>, %arg2: memref<16x128xf32, #tpu.memory_space<vmem>>, %arg3: memref<1x1xf32, #tpu.memory_space<smem>>, %arg4: memref<3x8x128xf32, #tpu.memory_space<vmem>>) attributes {dimension_semantics = [#tpu.dimension_semantics<arbitrary>], iteration_bounds = array<i64: 1>, scalar_prefetch = 0 : i64, scratch_operands = 1 : i64, tpu.core_type = #tpu.core_type<tc>, window_params = [{transform_indices = @transform_0, window_bounds = array<i64: 16, 128>}, {transform_indices = @transform_1, window_bounds = array<i64: 16, 128>}, {transform_indices = @transform_2, window_bounds = array<i64: 1, 1>}]} {
    %c0_i32 = arith.constant 0 : i32
    %0 = arith.cmpi eq, %arg0, %c0_i32 : i32
    %1 = arith.extui %0 : i1 to i32
    %c0_i32_0 = arith.constant 0 : i32
    %2 = arith.cmpi ne, %1, %c0_i32_0 : i32
    scf.if %2 {
      %cst_25 = arith.constant 0.000000e+00 : f32
      %37 = vector.broadcast %cst_25 : f32 to vector<3x8x128xf32>
      %c0_26 = arith.constant 0 : index
      %c0_27 = arith.constant 0 : index
      %c0_28 = arith.constant 0 : index
      %38 = vector.load %arg4[%c0_26, %c0_27, %c0_28] : memref<3x8x128xf32, #tpu.memory_space<vmem>>, vector<3x8x128xf32>
      tpu.vector_store %arg4[%c0_26, %c0_27, %c0_28], %37 {strides = array<i32>} : memref<3x8x128xf32, #tpu.memory_space<vmem>>, vector<3x8x128xf32>,
    } else {
    }
    %c0 = arith.constant 0 : index
    %c0_1 = arith.constant 0 : index
    %3 = vector.load %arg1[%c0, %c0_1] : memref<16x128xf32, #tpu.memory_space<vmem>>, vector<16x128xf32>
    %4 = arith.negf %3 : vector<16x128xf32>
    %5 = math.exp %4 : vector<16x128xf32>
    %cst = arith.constant 1.000000e+00 : f32
    %6 = vector.broadcast %cst : f32 to vector<16x128xf32>
    %7 = arith.addf %6, %5 : vector<16x128xf32>
    %8 = arith.divf %6, %7 : vector<16x128xf32>
    %c0_2 = arith.constant 0 : index
    %c0_3 = arith.constant 0 : index
    %9 = vector.load %arg2[%c0_2, %c0_3] : memref<16x128xf32, #tpu.memory_space<vmem>>, vector<16x128xf32>
    %10 = vector.shape_cast %8 : vector<16x128xf32> to vector<2x8x128xf32>
    %11 = vector.shape_cast %9 : vector<16x128xf32> to vector<2x8x128xf32>
    %c0_4 = arith.constant 0 : index
    %c0_5 = arith.constant 0 : index
    %c0_6 = arith.constant 0 : index
    %12 = vector.load %arg4[%c0_4, %c0_5, %c0_6] : memref<3x8x128xf32, #tpu.memory_space<vmem>>, vector<1x8x128xf32>
    %13 = vector.shape_cast %12 : vector<1x8x128xf32> to vector<8x128xf32>
    %14 = arith.mulf %10, %11 : vector<2x8x128xf32>
    %cst_7 = arith.constant dense<0.000000e+00> : vector<8x128xf32>
    %15 = vector.multi_reduction <add>, %14, %cst_7 [0] : vector<2x8x128xf32> to vector<8x128xf32>
    %16 = arith.addf %13, %15 : vector<8x128xf32>
    %c0_8 = arith.constant 0 : index
    %c0_9 = arith.constant 0 : index
    %c0_10 = arith.constant 0 : index
    %17 = vector.load %arg4[%c0_8, %c0_9, %c0_10] : memref<3x8x128xf32, #tpu.memory_space<vmem>>, vector<1x8x128xf32>
    %18 = vector.shape_cast %17 : vector<1x8x128xf32> to vector<8x128xf32>
    %19 = vector.shape_cast %16 : vector<8x128xf32> to vector<1x8x128xf32>
    tpu.vector_store %arg4[%c0_8, %c0_9, %c0_10], %19 {strides = array<i32>} : memref<3x8x128xf32, #tpu.memory_space<vmem>>, vector<1x8x128xf32>,
    %c1 = arith.constant 1 : index
    %c0_11 = arith.constant 0 : index
    %c0_12 = arith.constant 0 : index
    %20 = vector.load %arg4[%c1, %c0_11, %c0_12] : memref<3x8x128xf32, #tpu.memory_space<vmem>>, vector<1x8x128xf32>
    %21 = vector.shape_cast %20 : vector<1x8x128xf32> to vector<8x128xf32>
    %cst_13 = arith.constant dense<0.000000e+00> : vector<8x128xf32>
    %22 = vector.multi_reduction <add>, %10, %cst_13 [0] : vector<2x8x128xf32> to vector<8x128xf32>
    %23 = arith.addf %21, %22 : vector<8x128xf32>
    %c1_14 = arith.constant 1 : index
    %c0_15 = arith.constant 0 : index
    %c0_16 = arith.constant 0 : index
    %24 = vector.load %arg4[%c1_14, %c0_15, %c0_16] : memref<3x8x128xf32, #tpu.memory_space<vmem>>, vector<1x8x128xf32>
    %25 = vector.shape_cast %24 : vector<1x8x128xf32> to vector<8x128xf32>
    %26 = vector.shape_cast %23 : vector<8x128xf32> to vector<1x8x128xf32>
    tpu.vector_store %arg4[%c1_14, %c0_15, %c0_16], %26 {strides = array<i32>} : memref<3x8x128xf32, #tpu.memory_space<vmem>>, vector<1x8x128xf32>,
    %c2 = arith.constant 2 : index
    %c0_17 = arith.constant 0 : index
    %c0_18 = arith.constant 0 : index
    %27 = vector.load %arg4[%c2, %c0_17, %c0_18] : memref<3x8x128xf32, #tpu.memory_space<vmem>>, vector<1x8x128xf32>
    %28 = vector.shape_cast %27 : vector<1x8x128xf32> to vector<8x128xf32>
    %cst_19 = arith.constant dense<0.000000e+00> : vector<8x128xf32>
    %29 = vector.multi_reduction <add>, %11, %cst_19 [0] : vector<2x8x128xf32> to vector<8x128xf32>
    %30 = arith.addf %28, %29 : vector<8x128xf32>
    %c2_20 = arith.constant 2 : index
    %c0_21 = arith.constant 0 : index
    %c0_22 = arith.constant 0 : index
    %31 = vector.load %arg4[%c2_20, %c0_21, %c0_22] : memref<3x8x128xf32, #tpu.memory_space<vmem>>, vector<1x8x128xf32>
    %32 = vector.shape_cast %31 : vector<1x8x128xf32> to vector<8x128xf32>
    %33 = vector.shape_cast %30 : vector<8x128xf32> to vector<1x8x128xf32>
    tpu.vector_store %arg4[%c2_20, %c0_21, %c0_22], %33 {strides = array<i32>} : memref<3x8x128xf32, #tpu.memory_space<vmem>>, vector<1x8x128xf32>,
    %c0_i32_23 = arith.constant 0 : i32
    %34 = arith.cmpi eq, %arg0, %c0_i32_23 : i32
    %35 = arith.extui %34 : i1 to i32
    %c0_i32_24 = arith.constant 0 : i32
    %36 = arith.cmpi ne, %35, %c0_i32_24 : i32
    scf.if %36 {
      %c0_25 = arith.constant 0 : index
      %c0_26 = arith.constant 0 : index
      %c0_27 = arith.constant 0 : index
      %37 = vector.load %arg4[%c0_25, %c0_26, %c0_27] : memref<3x8x128xf32, #tpu.memory_space<vmem>>, vector<1x8x128xf32>
      %38 = vector.shape_cast %37 : vector<1x8x128xf32> to vector<8x128xf32>
      %39 = vector.shape_cast %38 : vector<8x128xf32> to vector<1x8x128xf32>
      %cst_28 = arith.constant dense<0.000000e+00> : vector<1xf32>
      %40 = vector.multi_reduction <add>, %39, %cst_28 [1, 2] : vector<1x8x128xf32> to vector<1xf32>
      %41 = vector.shape_cast %40 : vector<1xf32> to vector<1x1x1xf32>
      %42 = vector.extract %41[0, 0, 0] : f32 from vector<1x1x1xf32>
      %c1_29 = arith.constant 1 : index
      %c0_30 = arith.constant 0 : index
      %c0_31 = arith.constant 0 : index
      %43 = vector.load %arg4[%c1_29, %c0_30, %c0_31] : memref<3x8x128xf32, #tpu.memory_space<vmem>>, vector<1x8x128xf32>
      %44 = vector.shape_cast %43 : vector<1x8x128xf32> to vector<8x128xf32>
      %45 = vector.shape_cast %44 : vector<8x128xf32> to vector<1x8x128xf32>
      %cst_32 = arith.constant dense<0.000000e+00> : vector<1xf32>
      %46 = vector.multi_reduction <add>, %45, %cst_32 [1, 2] : vector<1x8x128xf32> to vector<1xf32>
      %47 = vector.shape_cast %46 : vector<1xf32> to vector<1x1x1xf32>
      %48 = vector.extract %47[0, 0, 0] : f32 from vector<1x1x1xf32>
      %c2_33 = arith.constant 2 : index
      %c0_34 = arith.constant 0 : index
      %c0_35 = arith.constant 0 : index
      %49 = vector.load %arg4[%c2_33, %c0_34, %c0_35] : memref<3x8x128xf32, #tpu.memory_space<vmem>>, vector<1x8x128xf32>
      %50 = vector.shape_cast %49 : vector<1x8x128xf32> to vector<8x128xf32>
      %51 = vector.shape_cast %50 : vector<8x128xf32> to vector<1x8x128xf32>
      %cst_36 = arith.constant dense<0.000000e+00> : vector<1xf32>
      %52 = vector.multi_reduction <add>, %51, %cst_36 [1, 2] : vector<1x8x128xf32> to vector<1xf32>
      %53 = vector.shape_cast %52 : vector<1xf32> to vector<1x1x1xf32>
      %54 = vector.extract %53[0, 0, 0] : f32 from vector<1x1x1xf32>
      %cst_37 = arith.constant 2.000000e+00 : f32
      %55 = arith.mulf %cst_37, %42 : f32
      %cst_38 = arith.constant 1.000000e+00 : f32
      %56 = arith.addf %55, %cst_38 : f32
      %57 = arith.addf %48, %54 : f32
      %cst_39 = arith.constant 1.000000e+00 : f32
      %58 = arith.addf %57, %cst_39 : f32
      %59 = arith.divf %56, %58 : f32
      %cst_40 = arith.constant 1.000000e+00 : f32
      %60 = arith.subf %cst_40, %59 : f32
      %c0_41 = arith.constant 0 : index
      %c0_42 = arith.constant 0 : index
      %61 = memref.load %arg3[%c0_41, %c0_42] : memref<1x1xf32, #tpu.memory_space<smem>>
      memref.store %60, %arg3[%c0_41, %c0_42] : memref<1x1xf32, #tpu.memory_space<smem>>
    } else {
    }
    return
  }
  func.func @transform_0(%arg0: i32) -> (i32, i32) {
    %c0_i32 = arith.constant 0 : i32
    %c0_i32_0 = arith.constant 0 : i32
    return %arg0, %c0_i32 : i32, i32
  }
  func.func @transform_1(%arg0: i32) -> (i32, i32) {
    %c0_i32 = arith.constant 0 : i32
    %c0_i32_0 = arith.constant 0 : i32
    return %arg0, %c0_i32 : i32, i32
  }
  func.func @transform_2(%arg0: i32) -> (i32, i32) {
    %c0_i32 = arith.constant 0 : i32
    %c0_i32_0 = arith.constant 0 : i32
    %c0_i32_1 = arith.constant 0 : i32
    return %c0_i32, %c0_i32_0 : i32, i32
  }
}

</mosaic_0001>

<bundles_post_ra>
// kernel: tpu_custom_call.1
= control target key start
LH: loop header
LB: loop body
LE: loop exit
PB: predicated region body
PF: predicated region fallthrough
CT: control target
= control target key end

     0   :  { %7 = vsyncpa [#allocation4], 0  ;;  %s279_s0 = inlined_call_operand.hbm [shape: f32[16,128], index: 0, kind: input, shape index: {}]   ;;  %s280_s1 = inlined_call_operand.hbm [shape: f32[16,128], index: 1, kind: input, shape index: {}]   ;;  %s281_s2 = inlined_call_operand.hbm [shape: f32[1,1], index: 2, kind: output, shape index: {}]  }
   0x1   :  { %8 = vsyncpa [#allocation7], 0 }
   0x2   :  { %9 = vsyncpa [#allocation5], 0  ;;  %s223_s9 = smov [#allocation3]   ;;  %s163_s13 = scalar_lea.hbm %s279_s0, 256 }
   0x3   :  { %s15_s10 = sshll.u32 %s223_s9, 4  ;;  %p164_p0 = scmp.ne.s32.totalorder %s279_s0, %s163_s13  ;;  %s16_s10 = int_to_ptr.vmem [resolvable:$true] %s15_s10 }
   0x4   :  { %p167_p1 = scmp.lt.u32.totalorder %s163_s13, %s279_s0 }
   0x6   :  { %p169_p2 = pnand %p167_p1, %p164_p0 }
   0x8   :  { %172 = shalt.err (!%p169_p2)
}
   0x9   :  { %s173_s18 = scalar_lea.vmem %s16_s10, 256  ;;  %p178_p4 = scmp.lt.s32.totalorder %s16_s10, %s16_s10 }
   0xa   :  { %p174_p3 = scmp.ne.s32.totalorder %s16_s10, %s173_s18  ;;  %p179_p5 = scmp.lt.s32.totalorder %s173_s18, %s173_s18 }
   0xc   :  { %p180_p6 = por %p179_p5, %p178_p4 }
   0xe   :  { %p181_p7 = pnand %p180_p6, %p174_p3 }
  0x10   :  { %184 = shalt.err (!%p181_p7)
}
  0x11   :  { %s224_s19 = smov 128   ;;  %s225_s20 = smov 8  }
  0x12   :  { %21 = dma.hbm_to_vmem [thread:$0]  %s279_s0, 256, %s16_s10, [#allocation4], %s224_s19, %s224_s19, %s225_s20  }
  0x13   :  { %s226_s23 = smov [#allocation6]   ;;  %s185_s27 = scalar_lea.hbm %s280_s1, 256 }
  0x14   :  { %s27_s24 = sshll.u32 %s226_s23, 4  ;;  %p186_p8 = scmp.ne.s32.totalorder %s280_s1, %s185_s27  ;;  %s28_s24 = int_to_ptr.vmem [resolvable:$true] %s27_s24 }
  0x15   :  { %p189_p9 = scmp.lt.u32.totalorder %s185_s27, %s280_s1 }
  0x17   :  { %p191_p10 = pnand %p189_p9, %p186_p8 }
  0x19   :  { %194 = shalt.err (!%p191_p10)
}
  0x1a   :  { %s195_s4 = scalar_lea.vmem %s28_s24, 256  ;;  %p200_p12 = scmp.lt.s32.totalorder %s28_s24, %s28_s24 }
  0x1b   :  { %p196_p11 = scmp.ne.s32.totalorder %s28_s24, %s195_s4  ;;  %p201_p13 = scmp.lt.s32.totalorder %s195_s4, %s195_s4 }
  0x1d   :  { %p202_p0 = por %p201_p13, %p200_p12 }
  0x1f   :  { %p203_p1 = pnand %p202_p0, %p196_p11 }
  0x21   :  { %206 = shalt.err (!%p203_p1)
}
  0x22   :  { %33 = dma.hbm_to_vmem [thread:$0]  %s280_s1, 256, %s28_s24, [#allocation7], %s224_s19, %s224_s19, %s225_s20  }
  0x23   :  { %217 = dma.done.wait [#allocation4], 256  }
  0x24   :  { %218 = vsyncadd [#allocation4], 4294967040 }
  0x25   :  { %219 = dma.done.wait [#allocation7], 256  }
  0x26   :  { %220 = vsyncadd [#allocation7], 4294967040  ;;  %v61_v0 = vld [vmem:[#allocation6] sm:$0xff]  ;;  %v62_v1 = vld [vmem:[#allocation6 + $0x8] sm:$0xff]  ;;  %s207_s17 = scalar_lea.hbm %s281_s2, 16 }
  0x27   :  { %v47_v2 = vld [vmem:[#allocation3] sm:$0xff]  ;;  %v76_v3 = vadd.f32 %v62_v1, %v61_v0  ;;  %v48_v4 = vld [vmem:[#allocation3 + $0x8] sm:$0xff]  ;;  %p208_p2 = scmp.ne.s32.totalorder %s281_s2, %s207_s17  ;;  %p211_p3 = scmp.lt.u32.totalorder %s207_s17, %s281_s2 }
  0x28   :  { %v138_v5 = vmul.f32 -1.442695, %v47_v2  ;;  %v139_v6 = vmul.f32 -1.442695, %v48_v4 }
  0x29   :  { %103 = vadd.xlane.f32.xlu1 %v76_v3  ;;  %p213_p4 = pnand %p211_p3, %p208_p2 }
  0x2a   :  { %153 = vpow2.f32 %v138_v5 }
  0x2b   :  { %155 = vpow2.f32 %v139_v6 }
  0x34   :  { %v154_v7 = vpop.eup %153 }
  0x35   :  { %v156_v8 = vpop.eup %155  ;;  %v55_v9 = vadd.f32 1.0, %v154_v7 }
  0x36   :  { %v56_v10 = vadd.f32 1.0, %v156_v8 }
  0x37   :  { %157 = vrcp.f32 %v55_v9 }
  0x38   :  { %159 = vrcp.f32 %v56_v10 }
  0x41   :  { %v158_v11 = vpop.eup %157 }
  0x42   :  { %v160_v12 = vpop.eup %159  ;;  %v64_v13 = vmul.f32 %v158_v11, %v61_v0 }
  0x43   :  { %v65_v14 = vmul.f32 %v160_v12, %v62_v1  ;;  %v71_v16 = vadd.f32 %v160_v12, %v158_v11 }
  0x45   :  { %v66_v15 = vadd.f32 %v65_v14, %v64_v13 }
  0x47   :  { %83 = vadd.xlane.f32.xlu0 %v66_v15 }
  0x4b   :  { %93 = vadd.xlane.f32.xlu0 %v71_v16 }
  0xb6   :  { %v104_v17 = vpop.xlane.xlu1 %103 }
  0xb7   :  { %v105_v18 = vrot.slane %v104_v17, 4 }
  0xb9   :  { %v106_v19 = vadd.f32 %v105_v18, %v104_v17 }
  0xbb   :  { %v107_v23 = vrot.slane %v106_v19, 2 }
  0xbd   :  { %v108_v29 = vadd.f32 %v107_v23, %v106_v19 }
  0xbf   :  { %v109_v34 = vrot.slane %v108_v29, 1 }
  0xc1   :  { %v110_v37 = vadd.f32 %v109_v34, %v108_v29 }
  0xd4   :  { %v84_v20 = vpop.xlane.xlu0 %83 }
  0xd5   :  { %v85_v21 = vrot.slane %v84_v20, 4 }
  0xd7   :  { %v86_v22 = vadd.f32 %v85_v21, %v84_v20 }
  0xd8   :  { %v94_v24 = vpop.xlane.xlu0 %93 }
  0xd9   :  { %v87_v25 = vrot.slane %v86_v22, 2  ;;  %v95_v26 = vrot.slane %v94_v24, 4 }
  0xdb   :  { %v96_v27 = vadd.f32 %v95_v26, %v94_v24  ;;  %v88_v28 = vadd.f32 %v87_v25, %v86_v22 }
  0xdd   :  { %v97_v30 = vrot.slane %v96_v27, 2  ;;  %v89_v31 = vrot.slane %v88_v28, 1 }
  0xdf   :  { %v98_v32 = vadd.f32 %v97_v30, %v96_v27  ;;  %v90_v33 = vadd.f32 %v89_v31, %v88_v28 }
  0xe1   :  { %140 = vpush %v90_v33  ;;  %v99_v35 = vrot.slane %v98_v32, 1 }
  0xe3   :  { %v100_v36 = vadd.f32 %v99_v35, %v98_v32 }
  0xe5   :  { %142 = vpush %v100_v36 }
  0xe6   :  { %144 = vpush %v110_v37 }
 0x112   :  { %s141_s1 = spop %140 }
 0x113   :  { %s112_s10 = smul.f32 2.0, %s141_s1 }
 0x115   :  { %s113_s11 = sadd.f32 1.0, %s112_s10 }
 0x116   :  { %s143_s6 = spop %142 }
 0x117   :  { %s145_s7 = spop %144 }
 0x118   :  { %s114_s8 = sadd.f32 %s145_s7, %s143_s6 }
 0x11a   :  { %s115_s9 = sadd.f32 1.0, %s114_s8 }
 0x11c   :  { %v116_v38 = vstv %s115_s9 }
 0x11d   :  { %161 = vrcp.f32 %v116_v38 }
 0x127   :  { %v162_v39 = vpop.eup %161 }
 0x128   :  { %146 = vpush %v162_v39 }
 0x159   :  { %s147_s12 = spop %146 }
 0x15a   :  { %s119_s13 = smul.f32 %s147_s12, %s113_s11 }
 0x15c   :  { %s120_s14 = ssub.f32 1.0, %s119_s13 }
 0x15e   :  { %122 = sst [smem:[#allocation8]] %s120_s14 }
 0x15f   :  { %216 = shalt.err (!%p213_p4)
}
 0x160   :  { %s227_s22 = smov [#allocation8]  }
 0x161   :  { %130 = dma.smem_to_hbm %s227_s22, 16, %s281_s2, [#allocation5]  }
 0x162   :  { %221 = dma.done.wait [#allocation5], 16  }
 0x163   :  { %222 = vsyncadd [#allocation5], 4294967280 }
 0x164   :  { %134 = sfence }
 0x165   :  { %135 = vsyncpa [#allocation4], 1 }
 0x166   :  { %136 = vsyncpa [#allocation7], 1 }
 0x167   :  { %137 = vsyncpa [#allocation5], 1 }

</bundles_post_ra>
